<compile_context>
chip_gen: v5e
topology: v5e:2x2
jax: 0.10.0
libtpu: 0.0.40
codegen_flags: <defaults>
</compile_context>

<pallas_src>
import jax
import jax.numpy as jnp
import numpy as np
from jax.experimental import pallas as pl
from jax.experimental.pallas import tpu as pltpu


def mlp_actor_kernel(obs_ref, w1_ref, w2_ref, w3_ref, cfg_ref, out_ref):
    """Feature-major MLP actor.

    obs_ref: [obs_dim, tb]   (batch on lanes)
    w*_ref:  [out, in]       (resident)
    cfg_ref: [max_len, 6]    columns = b1, b2, b3, (high-low), act_equ, obs_equ
    out_ref: [act_dim, tb]   lane-dense store
    """
    h1, obs_dim = w1_ref.shape
    h2 = w2_ref.shape[0]
    act_dim = w3_ref.shape[0]

    w1 = w1_ref[...]
    w2 = w2_ref[...]
    w3 = w3_ref[...]

    # Column slices: already the [features, 1] shape needed to broadcast over
    # the lane (batch) axis; static slices inside one (8,128) tile are free.
    b1 = cfg_ref[0:h1, 0:1]
    b2 = cfg_ref[0:h2, 1:2]
    b3 = cfg_ref[0:act_dim, 2:3]
    scale = cfg_ref[0:act_dim, 3:4]       # act_high - act_low
    act_equ = cfg_ref[0:act_dim, 4:5]
    obs_eq = cfg_ref[0:obs_dim, 5:6]      # equilibrium observation (column)

    def dot(w, x):
        # Cast activations to the weight dtype (no-op for f32; enables bf16
        # MXU path on v6e/v7x) while keeping f32 accumulation/elementwise.
        return jnp.dot(w, x.astype(w.dtype), preferred_element_type=jnp.float32)

    def pi(x):                            # x: [obs_dim, n] -> [act_dim, n]
        h = jnp.maximum(dot(w1, x) + b1, 0.0)
        h = jnp.maximum(dot(w2, h) + b2, 0.0)
        z = dot(w3, h) + b3
        # sigmoid(z) = 0.5 * tanh(z / 2) + 0.5 : tanh rides the EUP slot,
        # no VALU divide, no exp(-z) overflow; matches jax.nn.sigmoid.
        return 0.5 * jnp.tanh(0.5 * z) + 0.5

    sig = pi(obs_ref[...])                # [act_dim, tb]
    sig_eq = pi(obs_eq)                   # [act_dim, 1], broadcasts over lanes

    # ctrl - ctrl_eq + act_equ == (sig - sig_eq) * (high - low) + act_equ
    # (act_low cancels analytically).  Full lane-dense, unmasked tile store.
    out_ref[...] = (sig - sig_eq) * scale + act_equ


def _round_up(x, m):
    return ((x + m - 1) // m) * m


def mlp_actor_forward(obs, obs_equ, params, act_low, act_high, act_equ,
                      *, cols_per_tile=2048, weight_dtype=jnp.float32):
    """obs: [batch, obs_dim]; returns ctrl - ctrl_eq + act_equ: [batch, act_dim]."""
    (w1, b1), (w2, b2), (w3, b3) = params   # weights stored [in, out]
    batch, obs_dim = obs.shape
    h1, h2, act_dim = w1.shape[1], w2.shape[1], w3.shape[1]

    # Feature-major weights [out, in] so the kernel does W @ X on the MXU.
    w1t = jnp.asarray(w1.T, weight_dtype)
    w2t = jnp.asarray(w2.T, weight_dtype)
    w3t = jnp.asarray(w3.T, weight_dtype)

    # Single resident config array (one tiny DMA, 5 input refs total).
    max_len = max(h1, h2, act_dim, obs_dim)
    cfg = jnp.zeros((max_len, 6), jnp.float32)
    cfg = cfg.at[:h1, 0].set(b1)
    cfg = cfg.at[:h2, 1].set(b2)
    cfg = cfg.at[:act_dim, 2].set(b3)
    cfg = cfg.at[:act_dim, 3].set(act_high - act_low)
    cfg = cfg.at[:act_dim, 4].set(act_equ)
    cfg = cfg.at[:obs_dim, 5].set(obs_equ)

    # Batch lives on lanes: pad to a multiple of 128 so every vreg is dense
    # and stores are unmasked.  Cap the tile at cols_per_tile and, when the
    # batch is big enough, keep >= 2 grid steps so v7x's two TensorCores both
    # get work; pad the batch up to a multiple of the tile (no giant-tile
    # fallback, so the scoped VMEM limit is respected for any batch).
    pb = _round_up(batch, 128)
    if pb <= 128:
        tb = pb
    else:
        tb = max(128, min(cols_per_tile, _round_up(pb // 2, 128)))
    pb = _round_up(pb, tb)
    grid = (pb // tb,)

    obs_fm = jnp.zeros((obs_dim, pb), jnp.float32).at[:, :batch].set(obs.T)

    flops = 2 * pb * (obs_dim * h1 + h1 * h2 + h2 * act_dim)
    bytes_accessed = (4 * (obs_dim * pb + act_dim * pb + max_len * 6)
                      + int(w1t.size + w2t.size + w3t.size)
                      * jnp.dtype(weight_dtype).itemsize)
    cost = pl.CostEstimate(flops=int(flops),
                           transcendentals=int(pb * act_dim),
                           bytes_accessed=int(bytes_accessed))

    const = lambda i: (0, 0)
    out_fm = pl.pallas_call(
        mlp_actor_kernel,
        out_shape=jax.ShapeDtypeStruct((act_dim, pb), jnp.float32),
        grid=grid,
        in_specs=[
            pl.BlockSpec((obs_dim, tb), lambda i: (0, i)),   # obs (lane-tiled)
            pl.BlockSpec(w1t.shape, const),                  # resident weights
            pl.BlockSpec(w2t.shape, const),
            pl.BlockSpec(w3t.shape, const),
            pl.BlockSpec(cfg.shape, const),                  # resident config
        ],
        out_specs=pl.BlockSpec((act_dim, tb), lambda i: (0, i)),
        compiler_params=pltpu.CompilerParams(
            dimension_semantics=("parallel",)),
        cost_estimate=cost,
    )(obs_fm, w1t, w2t, w3t, cfg)

    # Tiny [act_dim, batch] -> [batch, act_dim] transpose in XLA (negligible
    # vs. the lane-dense in-kernel compute/store it buys).
    return out_fm[:, :batch].T


def init_params(key, sizes):
    """Deterministic init of Linear layers; weights stored as [in, out]."""
    params = []
    for j in range(len(sizes) - 1):
        key, kw, kb = jax.random.split(key, 3)
        fan_in = sizes[j]
        bound = 1.0 / np.sqrt(fan_in)
        w = jax.random.uniform(kw, (sizes[j], sizes[j + 1]), jnp.float32,
                               minval=-bound, maxval=bound)
        b = jax.random.uniform(kb, (sizes[j + 1],), jnp.float32,
                               minval=-bound, maxval=bound)
        params.append((w, b))
    return params


def reference_forward(obs, obs_equ, params, act_low, act_high, act_equ):
    def pi(x):
        (w1, b1), (w2, b2), (w3, b3) = params
        h = jnp.maximum(x @ w1 + b1, 0.0)
        h = jnp.maximum(h @ w2 + b2, 0.0)
        return jax.nn.sigmoid(h @ w3 + b3)

    ctrl_eq = pi(obs_equ) * (act_high - act_low) + act_low
    ctrl = pi(obs) * (act_high - act_low) + act_low
    return ctrl - ctrl_eq + act_equ


if __name__ == "__main__":
    key = jax.random.PRNGKey(0)

    batch = 2
    obs_dim = 8
    act_dim = 4
    hidden_sizes = (32, 32)
    sizes = [obs_dim] + list(hidden_sizes) + [act_dim]

    key, k_obs, k_equ, k_act_equ, k_params = jax.random.split(key, 5)
    obs = jax.random.normal(k_obs, (batch, obs_dim), jnp.float32)
    obs_equ = jax.random.normal(k_equ, (obs_dim,), jnp.float32)
    act_equ = jax.random.normal(k_act_equ, (act_dim,), jnp.float32)
    act_low = jnp.full((act_dim,), -1.5, jnp.float32)
    act_high = jnp.full((act_dim,), 2.0, jnp.float32)

    params = init_params(k_params, sizes)

    fwd = jax.jit(mlp_actor_forward)
    out = fwd(obs, obs_equ, params, act_low, act_high, act_equ)
    out = jax.block_until_ready(out)

    ref = reference_forward(obs, obs_equ, params, act_low, act_high, act_equ)
    np.testing.assert_allclose(np.asarray(out), np.asarray(ref),
                               rtol=1e-4, atol=1e-4)
    print("KERNEL_OK")
</pallas_src>

<mosaic_0001>
module attributes {stable_mosaic.version = 11 : i64} {
  func.func @mlp_actor_kernel(%arg0: i32, %arg1: memref<8x128xf32, #tpu.memory_space<vmem>>, %arg2: memref<32x8xf32, #tpu.memory_space<vmem>>, %arg3: memref<32x32xf32, #tpu.memory_space<vmem>>, %arg4: memref<4x32xf32, #tpu.memory_space<vmem>>, %arg5: memref<32x6xf32, #tpu.memory_space<vmem>>, %arg6: memref<4x128xf32, #tpu.memory_space<vmem>>) attributes {dimension_semantics = [#tpu.dimension_semantics<parallel>], iteration_bounds = array<i64: 1>, scalar_prefetch = 0 : i64, scratch_operands = 0 : i64, tpu.core_type = #tpu.core_type<tc>, window_params = [{transform_indices = @transform_0, window_bounds = array<i64: 8, 128>}, {pipeline_mode = #tpu.pipeline_mode<synchronous>, transform_indices = @transform_1, window_bounds = array<i64: 32, 8>}, {pipeline_mode = #tpu.pipeline_mode<synchronous>, transform_indices = @transform_2, window_bounds = array<i64: 32, 32>}, {pipeline_mode = #tpu.pipeline_mode<synchronous>, transform_indices = @transform_3, window_bounds = array<i64: 4, 32>}, {pipeline_mode = #tpu.pipeline_mode<synchronous>, transform_indices = @transform_4, window_bounds = array<i64: 32, 6>}, {transform_indices = @transform_5, window_bounds = array<i64: 4, 128>}]} {
    %c0 = arith.constant 0 : index
    %c0_0 = arith.constant 0 : index
    %0 = vector.load %arg2[%c0, %c0_0] : memref<32x8xf32, #tpu.memory_space<vmem>>, vector<32x8xf32>
    %c0_1 = arith.constant 0 : index
    %c0_2 = arith.constant 0 : index
    %1 = vector.load %arg3[%c0_1, %c0_2] : memref<32x32xf32, #tpu.memory_space<vmem>>, vector<32x32xf32>
    %c0_3 = arith.constant 0 : index
    %c0_4 = arith.constant 0 : index
    %2 = vector.load %arg4[%c0_3, %c0_4] : memref<4x32xf32, #tpu.memory_space<vmem>>, vector<4x32xf32>
    %c0_5 = arith.constant 0 : index
    %c0_6 = arith.constant 0 : index
    %3 = vector.load %arg5[%c0_5, %c0_6] : memref<32x6xf32, #tpu.memory_space<vmem>>, vector<32x1xf32>
    %c0_7 = arith.constant 0 : index
    %c1 = arith.constant 1 : index
    %4 = vector.load %arg5[%c0_7, %c1] : memref<32x6xf32, #tpu.memory_space<vmem>>, vector<32x1xf32>
    %c0_8 = arith.constant 0 : index
    %c2 = arith.constant 2 : index
    %5 = vector.load %arg5[%c0_8, %c2] : memref<32x6xf32, #tpu.memory_space<vmem>>, vector<4x1xf32>
    %c0_9 = arith.constant 0 : index
    %c3 = arith.constant 3 : index
    %6 = vector.load %arg5[%c0_9, %c3] : memref<32x6xf32, #tpu.memory_space<vmem>>, vector<4x1xf32>
    %c0_10 = arith.constant 0 : index
    %c4 = arith.constant 4 : index
    %7 = vector.load %arg5[%c0_10, %c4] : memref<32x6xf32, #tpu.memory_space<vmem>>, vector<4x1xf32>
    %c0_11 = arith.constant 0 : index
    %c5 = arith.constant 5 : index
    %8 = vector.load %arg5[%c0_11, %c5] : memref<32x6xf32, #tpu.memory_space<vmem>>, vector<8x1xf32>
    %c0_12 = arith.constant 0 : index
    %c0_13 = arith.constant 0 : index
    %9 = vector.load %arg1[%c0_12, %c0_13] : memref<8x128xf32, #tpu.memory_space<vmem>>, vector<8x128xf32>
    %cst = arith.constant dense<0.000000e+00> : vector<32x128xf32>
    %10 = tpu.matmul %0, %9, %cst {dimension_numbers = #tpu.dot_dimension_numbers<[1], [0], [0], [1], [0, 0, 1, 1], [], []>} : vector<32x8xf32>, vector<8x128xf32>, vector<32x128xf32> -> vector<32x128xf32>
    %11 = vector.broadcast %3 : vector<32x1xf32> to vector<32x128xf32>
    %12 = arith.addf %10, %11 : vector<32x128xf32>
    %cst_14 = arith.constant 0.000000e+00 : f32
    %13 = vector.broadcast %cst_14 : f32 to vector<32x128xf32>
    %14 = arith.maximumf %12, %13 : vector<32x128xf32>
    %cst_15 = arith.constant dense<0.000000e+00> : vector<32x128xf32>
    %15 = tpu.matmul %1, %14, %cst_15 {dimension_numbers = #tpu.dot_dimension_numbers<[1], [0], [0], [1], [0, 0, 1, 1], [], []>} : vector<32x32xf32>, vector<32x128xf32>, vector<32x128xf32> -> vector<32x128xf32>
    %16 = vector.broadcast %4 : vector<32x1xf32> to vector<32x128xf32>
    %17 = arith.addf %15, %16 : vector<32x128xf32>
    %cst_16 = arith.constant 0.000000e+00 : f32
    %18 = vector.broadcast %cst_16 : f32 to vector<32x128xf32>
    %19 = arith.maximumf %17, %18 : vector<32x128xf32>
    %cst_17 = arith.constant dense<0.000000e+00> : vector<4x128xf32>
    %20 = tpu.matmul %2, %19, %cst_17 {dimension_numbers = #tpu.dot_dimension_numbers<[1], [0], [0], [1], [0, 0, 1, 1], [], []>} : vector<4x32xf32>, vector<32x128xf32>, vector<4x128xf32> -> vector<4x128xf32>
    %21 = vector.broadcast %5 : vector<4x1xf32> to vector<4x128xf32>
    %22 = arith.addf %20, %21 : vector<4x128xf32>
    %cst_18 = arith.constant 5.000000e-01 : f32
    %23 = vector.broadcast %cst_18 : f32 to vector<4x128xf32>
    %24 = arith.mulf %23, %22 : vector<4x128xf32>
    %25 = math.tanh %24 : vector<4x128xf32>
    %cst_19 = arith.constant 5.000000e-01 : f32
    %26 = vector.broadcast %cst_19 : f32 to vector<4x128xf32>
    %27 = arith.mulf %26, %25 : vector<4x128xf32>
    %cst_20 = arith.constant 5.000000e-01 : f32
    %28 = vector.broadcast %cst_20 : f32 to vector<4x128xf32>
    %29 = arith.addf %27, %28 : vector<4x128xf32>
    %cst_21 = arith.constant dense<0.000000e+00> : vector<32x1xf32>
    %30 = tpu.matmul %0, %8, %cst_21 {dimension_numbers = #tpu.dot_dimension_numbers<[1], [0], [0], [1], [0, 0, 1, 1], [], []>} : vector<32x8xf32>, vector<8x1xf32>, vector<32x1xf32> -> vector<32x1xf32>
    %31 = arith.addf %30, %3 : vector<32x1xf32>
    %cst_22 = arith.constant 0.000000e+00 : f32
    %32 = vector.broadcast %cst_22 : f32 to vector<32x1xf32>
    %33 = arith.maximumf %31, %32 : vector<32x1xf32>
    %cst_23 = arith.constant dense<0.000000e+00> : vector<32x1xf32>
    %34 = tpu.matmul %1, %33, %cst_23 {dimension_numbers = #tpu.dot_dimension_numbers<[1], [0], [0], [1], [0, 0, 1, 1], [], []>} : vector<32x32xf32>, vector<32x1xf32>, vector<32x1xf32> -> vector<32x1xf32>
    %35 = arith.addf %34, %4 : vector<32x1xf32>
    %cst_24 = arith.constant 0.000000e+00 : f32
    %36 = vector.broadcast %cst_24 : f32 to vector<32x1xf32>
    %37 = arith.maximumf %35, %36 : vector<32x1xf32>
    %cst_25 = arith.constant dense<0.000000e+00> : vector<4x1xf32>
    %38 = tpu.matmul %2, %37, %cst_25 {dimension_numbers = #tpu.dot_dimension_numbers<[1], [0], [0], [1], [0, 0, 1, 1], [], []>} : vector<4x32xf32>, vector<32x1xf32>, vector<4x1xf32> -> vector<4x1xf32>
    %39 = arith.addf %38, %5 : vector<4x1xf32>
    %cst_26 = arith.constant 5.000000e-01 : f32
    %40 = vector.broadcast %cst_26 : f32 to vector<4x1xf32>
    %41 = arith.mulf %40, %39 : vector<4x1xf32>
    %42 = math.tanh %41 : vector<4x1xf32>
    %cst_27 = arith.constant 5.000000e-01 : f32
    %43 = vector.broadcast %cst_27 : f32 to vector<4x1xf32>
    %44 = arith.mulf %43, %42 : vector<4x1xf32>
    %cst_28 = arith.constant 5.000000e-01 : f32
    %45 = vector.broadcast %cst_28 : f32 to vector<4x1xf32>
    %46 = arith.addf %44, %45 : vector<4x1xf32>
    %47 = vector.broadcast %46 : vector<4x1xf32> to vector<4x128xf32>
    %48 = arith.subf %29, %47 : vector<4x128xf32>
    %49 = vector.broadcast %6 : vector<4x1xf32> to vector<4x128xf32>
    %50 = arith.mulf %48, %49 : vector<4x128xf32>
    %51 = vector.broadcast %7 : vector<4x1xf32> to vector<4x128xf32>
    %52 = arith.addf %50, %51 : vector<4x128xf32>
    %c0_29 = arith.constant 0 : index
    %c0_30 = arith.constant 0 : index
    %53 = vector.load %arg6[%c0_29, %c0_30] : memref<4x128xf32, #tpu.memory_space<vmem>>, vector<4x128xf32>
    tpu.vector_store %arg6[%c0_29, %c0_30], %52 {strides = array<i32>} : memref<4x128xf32, #tpu.memory_space<vmem>>, vector<4x128xf32>,
    return
  }
  func.func @transform_0(%arg0: i32) -> (i32, i32) {
    %c0_i32 = arith.constant 0 : i32
    %c0_i32_0 = arith.constant 0 : i32
    return %c0_i32, %arg0 : i32, i32
  }
  func.func @transform_1(%arg0: i32) -> (i32, i32) {
    %c0_i32 = arith.constant 0 : i32
    %c0_i32_0 = arith.constant 0 : i32
    %c0_i32_1 = arith.constant 0 : i32
    return %c0_i32, %c0_i32_0 : i32, i32
  }
  func.func @transform_2(%arg0: i32) -> (i32, i32) {
    %c0_i32 = arith.constant 0 : i32
    %c0_i32_0 = arith.constant 0 : i32
    %c0_i32_1 = arith.constant 0 : i32
    return %c0_i32, %c0_i32_0 : i32, i32
  }
  func.func @transform_3(%arg0: i32) -> (i32, i32) {
    %c0_i32 = arith.constant 0 : i32
    %c0_i32_0 = arith.constant 0 : i32
    %c0_i32_1 = arith.constant 0 : i32
    return %c0_i32, %c0_i32_0 : i32, i32
  }
  func.func @transform_4(%arg0: i32) -> (i32, i32) {
    %c0_i32 = arith.constant 0 : i32
    %c0_i32_0 = arith.constant 0 : i32
    %c0_i32_1 = arith.constant 0 : i32
    return %c0_i32, %c0_i32_0 : i32, i32
  }
  func.func @transform_5(%arg0: i32) -> (i32, i32) {
    %c0_i32 = arith.constant 0 : i32
    %c0_i32_0 = arith.constant 0 : i32
    return %c0_i32, %arg0 : i32, i32
  }
}

</mosaic_0001>

<bundles_post_ra>
// kernel: mlp_actor_forward.1
= control target key start
LH: loop header
LB: loop body
LE: loop exit
PB: predicated region body
PF: predicated region fallthrough
CT: control target
= control target key end

     0   :  { %vm55_vm0 = vcmask 64512   ;;  %v364_v2 = vmov 0   ;;  %s365_s27 = smov 123   ;;  %v366_v16 = vmov 1   ;;  %vm117_vm1 = vcmask 261120   ;;  %s367_s18 = smov 127   ;;  %s499_s0 = inlined_call_operand.vmem [shape: f32[8,128], index: 0, kind: input, shape index: {}]   ;;  %s500_s1 = inlined_call_operand.vmem [shape: f32[32,8], index: 1, kind: input, shape index: {}]   ;;  %s501_s4 = inlined_call_operand.vmem [shape: f32[32,6], index: 4, kind: input, shape index: {}]   ;;  %s502_s2 = inlined_call_operand.vmem [shape: f32[32,32], index: 2, kind: input, shape index: {}]   ;;  %s503_s3 = inlined_call_operand.vmem [shape: f32[4,32], index: 3, kind: input, shape index: {}]   ;;  %s504_s5 = inlined_call_operand.vmem [shape: f32[4,128], index: 5, kind: output, shape index: {}]  }
   0x1   :  { %v34_v0 = vld [vmem:[%s499_s0] sm:$0xff]  ;;  %351 = vset.pattern.permute.xlu1 %v364_v2  ;;  %v411_v3 = vld [vmem:[%s501_s4 + $0x8] sm:$0xff]  ;;  %350 = vset.pattern.permute.xlu0 %v364_v2  ;;  %v423_v5 = vld [vmem:[%s501_s4 + $0x18] sm:$0xff]  ;;  %v368_v36 = vmov 2  }
   0x2   :  { %v20_v1 = vld [vmem:[%s500_s1] sm:$0xff]  ;;  %83 = vmatpush.msra.mxu0 %v34_v0  ;;  %42 = vperm.xlu1 %351, %v411_v3   ;;  %v21_v6 = vld [vmem:[%s500_s1 + $0x8] sm:$0xff]  ;;  %v433_v7 = vld [vmem:[%s501_s4 + $0x10] sm:$0xff] }
   0x3   :  { %v417_v4 = vld [vmem:[%s501_s4] sm:$0xff]  ;;  %324 = vmatmul.msk.f32.vlgmr.msra.gmra.mxu0 %vm55_vm0, %v20_v1  ;;  %52 = vperm.xlu0 %350, %v423_v5   ;;  %v22_v8 = vld [vmem:[%s500_s1 + $0x10] sm:$0xff]  ;;  %v23_v9 = vld [vmem:[%s500_s1 + $0x18] sm:$0xff] }
   0x4   :  { %195 = vrot.lane.b32.xlu2 %v417_v4, %s365_s27  ;;  %v24_v28 = vld [vmem:[%s502_s2] sm:$0xff]  ;;  %v25_v29 = vld [vmem:[%s502_s2 + $0x8] sm:$0xff]  ;;  %v26_v30 = vld [vmem:[%s502_s2 + $0x10] sm:$0xff] }
   0x5   :  { %352 = vset.pattern.permute.xlu2 %v366_v16  ;;  %v27_v31 = vld [vmem:[%s502_s2 + $0x18] sm:$0xff]  ;;  %v477_v40 = vld [vmem:[%s501_s4] sm:$0xf] }
   0x6   :  { %v28_v57 = vld [vmem:[%s503_s3] sm:$0xf]  ;;  %s369_s3 = smov 126  }
   0xa   :  { %37 = vperm.xlu1 %351, %v417_v4  }
   0xb   :  { %325 = vmatmul.msk.f32.gmra.mxu0 %vm55_vm0, %v21_v6  ;;  %47 = vperm.xlu0 %350, %v433_v7  }
   0xc   :  { %114 = vperm.xlu2 %352, %v423_v5  }
  0x12   :  { %354 = vset.pattern.permute.xlu1 %v366_v16 }
  0x13   :  { %326 = vmatmul.msk.f32.gmra.mxu0 %vm55_vm0, %v22_v8  ;;  %106 = vperm.xlu1 %354, %v411_v3  }
  0x14   :  { %353 = vset.pattern.permute.xlu0 %v366_v16  ;;  %102 = vperm.xlu2 %352, %v417_v4   ;;  %v370_v16 = vmov 4  }
  0x15   :  { %110 = vperm.xlu0 %353, %v433_v7  }
  0x1b   :  { %327 = vmatmul.msk.f32.gmra.mxu0 %vm55_vm0, %v23_v9  ;;  %356 = vset.pattern.permute.xlu1 %v364_v2 }
  0x1c   :  { %237 = vrot.lane.b32.xlu1 %v423_v5, %s367_s18  ;;  %235 = vrot.lane.b32.xlu2 %v433_v7, %s367_s18 }
  0x1d   :  { %233 = vrot.lane.b32.xlu0 %v411_v3, %s367_s18 }
  0x1e   :  { %355 = vset.pattern.permute.xlu0 %v368_v36 }
  0x24   :  { %231 = vrot.lane.b32.xlu1 %v417_v4, %s367_s18  ;;  %276 = vrot.lane.b32.xlu2 %v477_v40, %s369_s3 }
  0x25   :  { %165 = vperm.xlu0 %355, %v477_v40  }
  0x2d   :  { %359 = vset.pattern.permute.xlu0 %v370_v16 }
  0x5e   :  { %v196_v11 = vpop.permute.xlu2 %195 }
  0x5f   :  { %213 = vmatpush.msra.mxu3 %v196_v11 }
  0x60   :  { %333 = vmatmul.msk.f32.vlgmr.msra.gmra.mxu3 %vm55_vm0, %v20_v1 }
  0x66   :  { %v115_v37 = vpop.permute.xlu2 %114 }
  0x68   :  { %334 = vmatmul.msk.f32.gmra.mxu3 %vm55_vm0, %v21_v6 }
  0x6e   :  { %v103_v46 = vpop.permute.xlu2 %102 }
  0x70   :  { %335 = vmatmul.msk.f32.gmra.mxu3 %vm55_vm0, %v22_v8 }
  0x74   :  { %v43_v14 = vpop.permute.xlu1 %42 }
  0x75   :  { %v53_v13 = vpop.permute.xlu0 %52 }
  0x78   :  { %336 = vmatmul.msk.f32.gmra.mxu3 %vm55_vm0, %v23_v9 }
  0x7c   :  { %v38_v21 = vpop.permute.xlu1 %37 }
  0x7d   :  { %v48_v17 = vpop.permute.xlu0 %47 }
  0x80   :  { %v85_v10 = vpop.f32.mrf.mxu0 }
  0x81   :  { %v86_v24 = vadd.f32 %v85_v10, %v38_v21 }
  0x83   :  { %v97_v27 = vmax.f32 %v86_v24, 0.0 }
  0x85   :  { %v107_v42 = vpop.permute.xlu1 %106 }
  0x87   :  { %v111_v41 = vpop.permute.xlu0 %110 }
  0x88   :  { %v88_v12 = vpop.f32.mrf.mxu0 }
  0x89   :  { %v89_v22 = vadd.f32 %v88_v12, %v43_v14 }
  0x8b   :  { %v98_v26 = vmax.f32 %v89_v22, 0.0 }
  0x8e   :  { %v238_v2 = vpop.permute.xlu1 %237 }
  0x8f   :  { %v234_v8 = vpop.permute.xlu0 %233 }
  0x90   :  { %v91_v15 = vpop.f32.mrf.mxu0 }
  0x91   :  { %v92_v19 = vadd.f32 %v91_v15, %v48_v17  ;;  %v371_v17 = vmov 3  }
  0x92   :  { %357 = vset.pattern.permute.xlu2 %v371_v17 }
  0x93   :  { %v99_v25 = vmax.f32 %v92_v19, 0.0  ;;  %310 = vperm.xlu2 %357, %v477_v40  }
  0x96   :  { %v232_v9 = vpop.permute.xlu1 %231 }
  0x98   :  { %v94_v18 = vpop.f32.mrf.mxu0 }
  0x99   :  { %v95_v20 = vadd.f32 %v94_v18, %v53_v13 }
  0x9b   :  { %v100_v23 = vmax.f32 %v95_v20, 0.0 }
  0x9d   :  { %142 = vmatpush.msra.mxu1 %v100_v23 }
  0x9f   :  { %143 = vmatpush.msra.mxu1 %v99_v25  ;;  %v166_v25 = vpop.permute.xlu0 %165 }
  0xa1   :  { %144 = vmatpush.msra.mxu1 %v98_v26 }
  0xa3   :  { %145 = vmatpush.msra.mxu1 %v97_v27 }
  0xa4   :  { %328 = vmatmul.msk.f32.vlgmr.msra.gmra.mxu1 %vm117_vm1, %v24_v28 }
  0xac   :  { %329 = vmatmul.msk.f32.gmra.mxu1 %vm117_vm1, %v25_v29 }
  0xb4   :  { %330 = vmatmul.msk.f32.gmra.mxu1 %vm117_vm1, %v26_v30 }
  0xbc   :  { %331 = vmatmul.msk.f32.gmra.mxu1 %vm117_vm1, %v27_v31 }
  0xe3   :  { %v215_v32 = vpop.f32.mrf.mxu3 }
  0xe4   :  { %v216_v59 = vadd.f32 %v215_v32, %v417_v4  ;;  %v236_v4 = vpop.permute.xlu2 %235 }
  0xe6   :  { %v227_v62 = vmax.f32 %v216_v59, 0.0 }
  0xeb   :  { %v218_v34 = vpop.f32.mrf.mxu3 }
  0xec   :  { %v219_v58 = vadd.f32 %v218_v34, %v411_v3  ;;  %v277_v18 = vpop.permute.xlu2 %276 }
  0xee   :  { %v228_v61 = vmax.f32 %v219_v58, 0.0 }
  0xf3   :  { %v221_v39 = vpop.f32.mrf.mxu3 }
  0xf4   :  { %v222_v55 = vadd.f32 %v221_v39, %v433_v7 }
  0xf6   :  { %v229_v60 = vmax.f32 %v222_v55, 0.0 }
  0xfb   :  { %v224_v47 = vpop.f32.mrf.mxu3 }
  0xfc   :  { %v225_v52 = vadd.f32 %v224_v47, %v423_v5 }
  0xfe   :  { %v230_v56 = vmax.f32 %v225_v52, 0.0 }
 0x121   :  { %v147_v33 = vpop.f32.mrf.mxu1 }
 0x122   :  { %v148_v50 = vadd.f32 %v147_v33, %v103_v46  ;;  %v311_v33 = vpop.permute.xlu2 %310 }
 0x124   :  { %v159_v54 = vmax.f32 %v148_v50, 0.0 }
 0x129   :  { %v150_v35 = vpop.f32.mrf.mxu1 }
 0x12a   :  { %v151_v48 = vadd.f32 %v150_v35, %v107_v42 }
 0x12c   :  { %v160_v53 = vmax.f32 %v151_v48, 0.0 }
 0x131   :  { %v153_v38 = vpop.f32.mrf.mxu1 }
 0x132   :  { %v154_v44 = vadd.f32 %v153_v38, %v111_v41 }
 0x134   :  { %v161_v51 = vmax.f32 %v154_v44, 0.0 }
 0x139   :  { %v156_v43 = vpop.f32.mrf.mxu1 }
 0x13a   :  { %v157_v45 = vadd.f32 %v156_v43, %v115_v37 }
 0x13c   :  { %v162_v49 = vmax.f32 %v157_v45, 0.0 }
 0x13e   :  { %183 = vmatpush.msra.mxu2 %v162_v49 }
 0x140   :  { %184 = vmatpush.msra.mxu2 %v161_v51 }
 0x142   :  { %185 = vmatpush.msra.mxu2 %v160_v53 }
 0x144   :  { %186 = vmatpush.msra.mxu2 %v159_v54 }
 0x145   :  { %332 = vmatmul.msk.f32.vlgmr.msra.gmra.mxu2 %vm117_vm1, %v28_v57 }
 0x146   :  { %255 = vmatpush.msrb.mxu2 %v230_v56 }
 0x148   :  { %256 = vmatpush.msrb.mxu2 %v229_v60 }
 0x14a   :  { %257 = vmatpush.msrb.mxu2 %v228_v61 }
 0x14c   :  { %258 = vmatpush.msrb.mxu2 %v227_v62 }
 0x14d   :  { %337 = vmatmul.msk.f32.vlgmr.msrb.gmra.mxu2 %vm117_vm1, %v24_v28 }
 0x155   :  { %338 = vmatmul.msk.f32.gmra.mxu2 %vm117_vm1, %v25_v29 }
 0x15d   :  { %339 = vmatmul.msk.f32.gmra.mxu2 %vm117_vm1, %v26_v30 }
 0x165   :  { %340 = vmatmul.msk.f32.gmra.mxu2 %vm117_vm1, %v27_v31 }
 0x1c8   :  { %v188_v63 = vpop.f32.mrf.mxu2 }
 0x1c9   :  { %v189_v26 = vadd.f32 %v188_v63, %v166_v25 }
 0x1cb   :  { %v191_v27 = vmul.f32 0.5, %v189_v26 }
 0x1d0   :  { %v260_v0 = vpop.f32.mrf.mxu2 }
 0x1d1   :  { %v261_v12 = vadd.f32 %v260_v0, %v232_v9 }
 0x1d3   :  { %v272_v15 = vmax.f32 %v261_v12, 0.0 }
 0x1d8   :  { %v263_v1 = vpop.f32.mrf.mxu2 }
 0x1d9   :  { %v264_v10 = vadd.f32 %v263_v1, %v234_v8 }
 0x1db   :  { %v273_v14 = vmax.f32 %v264_v10, 0.0 }
 0x1e0   :  { %v266_v3 = vpop.f32.mrf.mxu2 }
 0x1e1   :  { %v267_v6 = vadd.f32 %v266_v3, %v236_v4 }
 0x1e3   :  { %v274_v13 = vmax.f32 %v267_v6, 0.0 }
 0x1e8   :  { %v269_v5 = vpop.f32.mrf.mxu2 }
 0x1e9   :  { %v270_v7 = vadd.f32 %v269_v5, %v238_v2 }
 0x1eb   :  { %v275_v11 = vmax.f32 %v270_v7, 0.0 }
 0x1ed   :  { %291 = vmatpush.msrb.mxu0 %v275_v11 }
 0x1ef   :  { %292 = vmatpush.msrb.mxu0 %v274_v13 }
 0x1f1   :  { %293 = vmatpush.msrb.mxu0 %v273_v14 }
 0x1f3   :  { %294 = vmatpush.msrb.mxu0 %v272_v15 }
 0x1f4   :  { %341 = vmatmul.msk.f32.vlgmr.msrb.gmra.mxu0 %vm117_vm1, %v28_v57 }
 0x271   :  { %v296_v19 = vpop.f32.mrf.mxu0 }
 0x272   :  { %v297_v20 = vadd.f32 %v296_v19, %v277_v18 }
 0x274   :  { %v299_v21 = vmul.f32 0.5, %v297_v20 }
 0x276   :  { %360 = vtanh.f32 %v299_v21 }
 0x277   :  { %362 = vtanh.f32 %v191_v27 }
 0x27c   :  { %v361_v22 = vpop.eup %360 }
 0x27d   :  { %v301_v23 = vmul.f32 0.5, %v361_v22  ;;  %v363_v28 = vpop.eup %362 }
 0x27e   :  { %v193_v29 = vmul.f32 0.5, %v363_v28 }
 0x27f   :  { %v302_v24 = vadd.f32 0.5, %v301_v23 }
 0x280   :  { %v194_v31 = vadd.f32 0.5, %v193_v29 }
 0x281   :  { %305 = vperm.xlu1 %356, %v302_v24  }
 0x289   :  { %358 = vset.pattern.permute.xlu1 %v370_v16 }
 0x28a   :  { %315 = vperm.xlu1 %358, %v477_v40  }
 0x2f3   :  { %v306_v30 = vpop.permute.xlu1 %305 }
 0x2f4   :  { %v308_v32 = vsub.f32 %v194_v31, %v306_v30 }
 0x2f6   :  { %v313_v34 = vmul.f32 %v311_v33, %v308_v32 }
 0x2fc   :  { %v316_v35 = vpop.permute.xlu1 %315 }
 0x2fd   :  { %v318_v36 = vadd.f32 %v316_v35, %v313_v34 }
 0x2ff   :  { %319 = vst [vmem:[%s504_s5] sm:$0xf] %v318_v36 }

</bundles_post_ra>
